<compile_context>
chip_gen: v6e
topology: v6e:2x2x1
jax: 0.10.0
libtpu: 0.0.40
codegen_flags: <defaults>
</compile_context>

<pallas_src>
import jax
import jax.numpy as jnp
from jax.experimental import pallas as pl
from jax.experimental.pallas import tpu as pltpu


def dpc_mlp_kernel(xt_ref, w1_ref, b1_ref, w2_ref, b2_ref, w3_ref, b3_ref, o_ref):
    xt = xt_ref[...]          # [2, tile_b] f32, batch on lanes
    w1 = w1_ref[...]          # [H, 2]      f32

    # Layer 1: Linear(2 -> H) + ReLU on the VPU (an MXU pass with K=2 would be
    # ~97% idle). Biases are kept as [H, 1] columns so they lane-broadcast.
    h = w1[:, 0:1] * xt[0:1, :] + w1[:, 1:2] * xt[1:2, :] + b1_ref[...]
    h = jnp.maximum(h, 0.0)                                     # [H, tile_b] f32

    # Layer 2: Linear(H -> H) + ReLU on the MXU, bf16 operands, f32 accumulate.
    h = jnp.dot(w2_ref[...], h.astype(jnp.bfloat16),
                preferred_element_type=jnp.float32)
    h = jnp.maximum(h + b2_ref[...], 0.0)                       # [H, tile_b] f32

    # Layer 3: Linear(H -> T) + sigmoid; output stays lane-dense [T, tile_b].
    z = jnp.dot(w3_ref[...], h.astype(jnp.bfloat16),
                preferred_element_type=jnp.float32)
    o_ref[...] = jax.nn.sigmoid(z + b3_ref[...]).astype(o_ref.dtype)


def _pick_tile_b(B, tile_b):
    """128-aligned batch tile; keep >= 2 grid steps when B allows (v7x megacore)."""
    tile_b = max(128, (tile_b // 128) * 128)
    b128 = pl.cdiv(B, 128) * 128
    tile_b = min(tile_b, b128)
    if b128 >= 2 * 128:
        half = pl.cdiv(b128 // 2, 128) * 128
        tile_b = min(tile_b, half)
    return tile_b


def dpc_model_forward_tb(x_t, params, *, tile_b=8192):
    """Native-layout forward: x_t [2, B] float32 -> [T, B] float32.

    No wrapper-side HBM passes: no padding, no transposes, no output slicing.
    params use PyTorch nn.Linear layout: w1 [H,2], b1 [H], w2 [H,H], b2 [H],
    w3 [T,H], b3 [T].
    """
    in_dim, B = x_t.shape
    assert in_dim == 2, "DPCModel has input_size = 2"

    w1 = params["w1"].astype(jnp.float32)        # layer 1 stays on the VPU in f32
    w2 = params["w2"].astype(jnp.bfloat16)       # MXU layers in bf16 (f32 acc)
    w3 = params["w3"].astype(jnp.bfloat16)
    H = w1.shape[0]
    T = w3.shape[0]
    b1 = params["b1"].reshape(H, 1).astype(jnp.float32)
    b2 = params["b2"].reshape(H, 1).astype(jnp.float32)
    b3 = params["b3"].reshape(T, 1).astype(jnp.float32)

    tile_b = _pick_tile_b(B, tile_b)
    grid = (pl.cdiv(B, tile_b),)                 # boundary block handles ragged B

    cost = pl.CostEstimate(
        flops=2 * B * (in_dim * H + H * H + H * T),
        transcendentals=B * T,                   # sigmoid
        bytes_accessed=(in_dim * B * 4 + T * B * 4
                        + H * in_dim * 4 + H * H * 2 + T * H * 2
                        + (2 * H + T) * 4),
    )

    out_t = pl.pallas_call(
        dpc_mlp_kernel,
        out_shape=jax.ShapeDtypeStruct((T, B), jnp.float32),
        grid=grid,
        in_specs=[
            pl.BlockSpec((in_dim, tile_b), lambda i: (0, i)),   # x^T tile (lane-dense)
            pl.BlockSpec((H, in_dim), lambda i: (0, 0)),        # w1 (resident)
            pl.BlockSpec((H, 1), lambda i: (0, 0)),             # b1
            pl.BlockSpec((H, H), lambda i: (0, 0)),             # w2 (bf16, resident)
            pl.BlockSpec((H, 1), lambda i: (0, 0)),             # b2
            pl.BlockSpec((T, H), lambda i: (0, 0)),             # w3 (bf16, resident)
            pl.BlockSpec((T, 1), lambda i: (0, 0)),             # b3
        ],
        out_specs=pl.BlockSpec((T, tile_b), lambda i: (0, i)),
        compiler_params=pltpu.CompilerParams(
            dimension_semantics=("parallel",),
        ),
        cost_estimate=cost,
    )(x_t, w1, b1, w2, b2, w3, b3)

    return out_t                                  # [T, B]


def dpc_model_forward(x, params, *, tile_b=8192):
    """PyTorch-module-layout forward: x [B, 2] -> [B, T].

    Only the two interface transposes are added on top of the native-layout
    entry point (x is 8 B/row, the output 16 B/row; both transposes together
    are cheaper than narrow 2-/4-lane kernel blocks would be).
    """
    B, in_dim = x.shape
    assert in_dim == 2, "DPCModel has input_size = 2"
    out_t = dpc_model_forward_tb(x.T, params, tile_b=tile_b)
    return out_t.T                                # [B, T]


def init_params(key, in_dim, hidden_dim, n_turbines):
    """nn.Linear-style init, weights stored in PyTorch [out, in] layout."""
    ks = jax.random.split(key, 6)

    def lin(kw, kb, fan_in, fan_out):
        bound = 1.0 / jnp.sqrt(jnp.float32(fan_in))
        w = jax.random.uniform(kw, (fan_out, fan_in), jnp.float32, -bound, bound)
        b = jax.random.uniform(kb, (fan_out,), jnp.float32, -bound, bound)
        return w, b

    w1, b1 = lin(ks[0], ks[1], in_dim, hidden_dim)
    w2, b2 = lin(ks[2], ks[3], hidden_dim, hidden_dim)
    w3, b3 = lin(ks[4], ks[5], hidden_dim, n_turbines)
    return {"w1": w1, "b1": b1, "w2": w2, "b2": b2, "w3": w3, "b3": b3}


def reference_forward(x, p):
    h = jnp.maximum(x @ p["w1"].T + p["b1"], 0.0)
    h = jnp.maximum(h @ p["w2"].T + p["b2"], 0.0)
    return jax.nn.sigmoid(h @ p["w3"].T + p["b3"])


if __name__ == "__main__":
    key = jax.random.PRNGKey(0)
    k_x, k_p = jax.random.split(key)

    batch = 200          # not a multiple of 128: exercises the boundary block
    in_dim = 2           # DPCModel input_size = 2
    hidden_dim = 64      # module default hidden_dim
    n_turbines = 4

    x = jax.random.normal(k_x, (batch, in_dim), jnp.float32)
    params = init_params(k_p, in_dim, hidden_dim, n_turbines)

    out = dpc_model_forward(x, params)           # tile clamps to 128, grid = 2
    out = jax.block_until_ready(out)

    ref = jax.block_until_ready(reference_forward(x, params))
    assert out.shape == (batch, n_turbines)
    # bf16 MXU operands (f32 accumulate): tolerance relaxed per review.
    assert jnp.max(jnp.abs(out - ref)) < 2e-3

    print("KERNEL_OK")
</pallas_src>

<mosaic_0001>
module attributes {stable_mosaic.version = 11 : i64} {
  func.func @dpc_mlp_kernel(%arg0: i32, %arg1: memref<2x128xf32, #tpu.memory_space<vmem>>, %arg2: memref<64x2xf32, #tpu.memory_space<vmem>>, %arg3: memref<64x1xf32, #tpu.memory_space<vmem>>, %arg4: memref<64x64xbf16, #tpu.memory_space<vmem>>, %arg5: memref<64x1xf32, #tpu.memory_space<vmem>>, %arg6: memref<4x64xbf16, #tpu.memory_space<vmem>>, %arg7: memref<4x1xf32, #tpu.memory_space<vmem>>, %arg8: memref<4x128xf32, #tpu.memory_space<vmem>>) attributes {dimension_semantics = [#tpu.dimension_semantics<parallel>], iteration_bounds = array<i64: 2>, scalar_prefetch = 0 : i64, scratch_operands = 0 : i64, tpu.core_type = #tpu.core_type<tc>, window_params = [{transform_indices = @transform_0, window_bounds = array<i64: 2, 128>}, {pipeline_mode = #tpu.pipeline_mode<synchronous>, transform_indices = @transform_1, window_bounds = array<i64: 64, 2>}, {pipeline_mode = #tpu.pipeline_mode<synchronous>, transform_indices = @transform_2, window_bounds = array<i64: 64, 1>}, {pipeline_mode = #tpu.pipeline_mode<synchronous>, transform_indices = @transform_3, window_bounds = array<i64: 64, 64>}, {pipeline_mode = #tpu.pipeline_mode<synchronous>, transform_indices = @transform_4, window_bounds = array<i64: 64, 1>}, {pipeline_mode = #tpu.pipeline_mode<synchronous>, transform_indices = @transform_5, window_bounds = array<i64: 4, 64>}, {pipeline_mode = #tpu.pipeline_mode<synchronous>, transform_indices = @transform_6, window_bounds = array<i64: 4, 1>}, {transform_indices = @transform_7, window_bounds = array<i64: 4, 128>}]} {
    %c0 = arith.constant 0 : index
    %c0_0 = arith.constant 0 : index
    %0 = vector.load %arg1[%c0, %c0_0] : memref<2x128xf32, #tpu.memory_space<vmem>>, vector<2x128xf32>
    %c0_1 = arith.constant 0 : index
    %c0_2 = arith.constant 0 : index
    %1 = vector.load %arg2[%c0_1, %c0_2] : memref<64x2xf32, #tpu.memory_space<vmem>>, vector<64x2xf32>
    %2 = vector.extract_strided_slice %1 {offsets = [0, 0], sizes = [64, 1], strides = [1, 1]} : vector<64x2xf32> to vector<64x1xf32>
    %3 = vector.extract_strided_slice %0 {offsets = [0, 0], sizes = [1, 128], strides = [1, 1]} : vector<2x128xf32> to vector<1x128xf32>
    %4 = vector.broadcast %2 : vector<64x1xf32> to vector<64x128xf32>
    %5 = vector.broadcast %3 : vector<1x128xf32> to vector<64x128xf32>
    %6 = arith.mulf %4, %5 : vector<64x128xf32>
    %7 = vector.extract_strided_slice %1 {offsets = [0, 1], sizes = [64, 1], strides = [1, 1]} : vector<64x2xf32> to vector<64x1xf32>
    %8 = vector.extract_strided_slice %0 {offsets = [1, 0], sizes = [1, 128], strides = [1, 1]} : vector<2x128xf32> to vector<1x128xf32>
    %9 = vector.broadcast %7 : vector<64x1xf32> to vector<64x128xf32>
    %10 = vector.broadcast %8 : vector<1x128xf32> to vector<64x128xf32>
    %11 = arith.mulf %9, %10 : vector<64x128xf32>
    %12 = arith.addf %6, %11 : vector<64x128xf32>
    %c0_3 = arith.constant 0 : index
    %c0_4 = arith.constant 0 : index
    %13 = vector.load %arg3[%c0_3, %c0_4] : memref<64x1xf32, #tpu.memory_space<vmem>>, vector<64x1xf32>
    %14 = vector.broadcast %13 : vector<64x1xf32> to vector<64x128xf32>
    %15 = arith.addf %12, %14 : vector<64x128xf32>
    %cst = arith.constant 0.000000e+00 : f32
    %16 = vector.broadcast %cst : f32 to vector<64x128xf32>
    %17 = arith.maximumf %15, %16 : vector<64x128xf32>
    %c0_5 = arith.constant 0 : index
    %c0_6 = arith.constant 0 : index
    %18 = vector.load %arg4[%c0_5, %c0_6] : memref<64x64xbf16, #tpu.memory_space<vmem>>, vector<64x64xbf16>
    %19 = arith.truncf %17 : vector<64x128xf32> to vector<64x128xbf16>
    %cst_7 = arith.constant dense<0.000000e+00> : vector<64x128xf32>
    %20 = tpu.matmul %18, %19, %cst_7 {dimension_numbers = #tpu.dot_dimension_numbers<[1], [0], [0], [1], [0, 0, 1, 1], [], []>} : vector<64x64xbf16>, vector<64x128xbf16>, vector<64x128xf32> -> vector<64x128xf32>
    %c0_8 = arith.constant 0 : index
    %c0_9 = arith.constant 0 : index
    %21 = vector.load %arg5[%c0_8, %c0_9] : memref<64x1xf32, #tpu.memory_space<vmem>>, vector<64x1xf32>
    %22 = vector.broadcast %21 : vector<64x1xf32> to vector<64x128xf32>
    %23 = arith.addf %20, %22 : vector<64x128xf32>
    %cst_10 = arith.constant 0.000000e+00 : f32
    %24 = vector.broadcast %cst_10 : f32 to vector<64x128xf32>
    %25 = arith.maximumf %23, %24 : vector<64x128xf32>
    %c0_11 = arith.constant 0 : index
    %c0_12 = arith.constant 0 : index
    %26 = vector.load %arg6[%c0_11, %c0_12] : memref<4x64xbf16, #tpu.memory_space<vmem>>, vector<4x64xbf16>
    %27 = arith.truncf %25 : vector<64x128xf32> to vector<64x128xbf16>
    %cst_13 = arith.constant dense<0.000000e+00> : vector<4x128xf32>
    %28 = tpu.matmul %26, %27, %cst_13 {dimension_numbers = #tpu.dot_dimension_numbers<[1], [0], [0], [1], [0, 0, 1, 1], [], []>} : vector<4x64xbf16>, vector<64x128xbf16>, vector<4x128xf32> -> vector<4x128xf32>
    %c0_14 = arith.constant 0 : index
    %c0_15 = arith.constant 0 : index
    %29 = vector.load %arg7[%c0_14, %c0_15] : memref<4x1xf32, #tpu.memory_space<vmem>>, vector<4x1xf32>
    %30 = vector.broadcast %29 : vector<4x1xf32> to vector<4x128xf32>
    %31 = arith.addf %28, %30 : vector<4x128xf32>
    %32 = arith.negf %31 : vector<4x128xf32>
    %33 = math.exp %32 : vector<4x128xf32>
    %cst_16 = arith.constant 1.000000e+00 : f32
    %34 = vector.broadcast %cst_16 : f32 to vector<4x128xf32>
    %35 = arith.addf %34, %33 : vector<4x128xf32>
    %36 = arith.divf %34, %35 : vector<4x128xf32>
    %c0_17 = arith.constant 0 : index
    %c0_18 = arith.constant 0 : index
    %37 = vector.load %arg8[%c0_17, %c0_18] : memref<4x128xf32, #tpu.memory_space<vmem>>, vector<4x128xf32>
    tpu.vector_store %arg8[%c0_17, %c0_18], %36 {strides = array<i32>} : memref<4x128xf32, #tpu.memory_space<vmem>>, vector<4x128xf32>,
    return
  }
  func.func @transform_0(%arg0: i32) -> (i32, i32) {
    %c0_i32 = arith.constant 0 : i32
    %c0_i32_0 = arith.constant 0 : i32
    return %c0_i32, %arg0 : i32, i32
  }
  func.func @transform_1(%arg0: i32) -> (i32, i32) {
    %c0_i32 = arith.constant 0 : i32
    %c0_i32_0 = arith.constant 0 : i32
    %c0_i32_1 = arith.constant 0 : i32
    return %c0_i32, %c0_i32_0 : i32, i32
  }
  func.func @transform_2(%arg0: i32) -> (i32, i32) {
    %c0_i32 = arith.constant 0 : i32
    %c0_i32_0 = arith.constant 0 : i32
    %c0_i32_1 = arith.constant 0 : i32
    return %c0_i32, %c0_i32_0 : i32, i32
  }
  func.func @transform_3(%arg0: i32) -> (i32, i32) {
    %c0_i32 = arith.constant 0 : i32
    %c0_i32_0 = arith.constant 0 : i32
    %c0_i32_1 = arith.constant 0 : i32
    return %c0_i32, %c0_i32_0 : i32, i32
  }
  func.func @transform_4(%arg0: i32) -> (i32, i32) {
    %c0_i32 = arith.constant 0 : i32
    %c0_i32_0 = arith.constant 0 : i32
    %c0_i32_1 = arith.constant 0 : i32
    return %c0_i32, %c0_i32_0 : i32, i32
  }
  func.func @transform_5(%arg0: i32) -> (i32, i32) {
    %c0_i32 = arith.constant 0 : i32
    %c0_i32_0 = arith.constant 0 : i32
    %c0_i32_1 = arith.constant 0 : i32
    return %c0_i32, %c0_i32_0 : i32, i32
  }
  func.func @transform_6(%arg0: i32) -> (i32, i32) {
    %c0_i32 = arith.constant 0 : i32
    %c0_i32_0 = arith.constant 0 : i32
    %c0_i32_1 = arith.constant 0 : i32
    return %c0_i32, %c0_i32_0 : i32, i32
  }
  func.func @transform_7(%arg0: i32) -> (i32, i32) {
    %c0_i32 = arith.constant 0 : i32
    %c0_i32_0 = arith.constant 0 : i32
    return %c0_i32, %arg0 : i32, i32
  }
}

</mosaic_0001>

<bundles_post_ra>
// kernel: tpu_custom_call.1
= control target key start
LH: loop header
LB: loop body
LE: loop exit
PB: predicated region body
PF: predicated region fallthrough
CT: control target
= control target key end

     0   :  { %12 = vsyncpa [#allocation3], 0  ;;  %s1169_s0 = inlined_call_operand.vmem [shape: f32[2,200], index: 0, kind: input, shape index: {}]   ;;  %s1170_s1 = inlined_call_operand.vmem [shape: f32[64,2], index: 1, kind: input, shape index: {}]   ;;  %s1171_s2 = inlined_call_operand.vmem [shape: f32[64,1], index: 2, kind: input, shape index: {}]   ;;  %s1172_s3 = inlined_call_operand.vmem [shape: bf16[64,64], index: 3, kind: input, shape index: {}]   ;;  %s1173_s4 = inlined_call_operand.vmem [shape: f32[64,1], index: 4, kind: input, shape index: {}]   ;;  %s1174_s5 = inlined_call_operand.vmem [shape: bf16[4,64], index: 5, kind: input, shape index: {}]   ;;  %s1175_s6 = inlined_call_operand.vmem [shape: f32[4,1], index: 6, kind: input, shape index: {}]   ;;  %s1176_s7 = inlined_call_operand.hbm [shape: f32[4,200], index: 7, kind: output, shape index: {}]  }
   0x1   :  { %14 = vsyncpa [#allocation3 + $0x1], 0  ;;  %s981_s24 = smov 0   ;;  %s983_s25 = smov 0  }
   0x2   :  { %s985_s26 = smov 0   ;;  %s987_s27 = smov 0  }
   0x3 LB: > { %s1002_s28 = sadd.s32 4294967295, %s934_s27   ;;  %s752_s29 = sadd.s32 4294967294, %s934_s27   ;;  %s934_s27 = sphi %s987_s27, %s1182_s27   ;;  %s930_s26 = sphi %s985_s26, %s1181_s26   ;;  %s926_s25 = sphi %s983_s25, %s1180_s25   ;;  %s922_s24 = sphi %s981_s24, %s1179_s24  }
   0x4   : > { %s1006_s30 = sadd.s32 1, %s934_s27   ;;  %s179_s8 = sadd.s32 1, %s930_s26 }
   0x5   : > { %s176_s9 = ssub.s32 %s934_s27, %s1006_s30  ;;  %p189_p0 = scmp.ne.s32.totalorder %s930_s26, %s926_s25 }
   0x6   : > { %p177_p1 = scmp.eq.s32.totalorder %s176_s9, 0  ;;  %p190_p2 = scmp.eq.s32.totalorder %s1002_s28, 1 }
   0x7   : > { %p195_p3 = scmp.ne.s32.totalorder %s926_s25, %s922_s24  ;;  %p196_p4 = scmp.eq.s32.totalorder %s752_s29, 1 }
   0x8   : > { %s1017_s10 = scalar_select %p177_p1, %s930_s26, %s179_s8  }
   0x9   : > { %p1019_p5 = por %p190_p2, %p189_p0  ;;  %p1023_p6 = por %p196_p4, %p195_p3 }
   0xa   : > { %p755_p7 = scmp.ge.s32.totalorder %s934_s27, 1  ;;  %p239_p8 = scmp.lt.s32.totalorder %s934_s27, 3 }
   0xc   : > { %p240_p9 = pnand %p755_p7, %p239_p8 }
   0xd   : > { %p270_p10 = scmp.lt.s32.totalorder (!%p240_p9), %s1002_s28, 1  ;;  %s267_s22 = sand.u32 (!%p240_p9), 1, %s926_s25  }
   0xe   : > { %243 = sbr.rel (%p240_p9) target bundleno = 684 (0x2ac), region = 48  ;;  %s680_s16 = scalar_lea.sflag (!%p240_p9), [#allocation3], %s267_s22 }
   0xf   : > { %s940_s18 = smov (!%p240_p9), [#allocation2]  }
  0x10   : > { %s878_s19 = sshll.u32 (!%p240_p9), %s940_s18, 4  ;;  %s879_s19 = int_to_ptr.vmem [resolvable:$false] %s878_s19 }
  0x13   : > { %v282_v0 = vld [vmem:[%s1170_s1 + $0x30] sm:$0xff]  ;;  %v280_v1 = vld [vmem:[%s1170_s1 + $0x20] sm:$0xff]  ;;  %v936_v2 = vmov 1   ;;  %v283_v3 = vld [vmem:[%s1170_s1 + $0x38] sm:$0xff]  ;;  %v937_v7 = vmov 0   ;;  %vm532_vm0 = vcmask 523264   ;;  %v324_v30 = vlaneseq }
  0x14   : > { %858 = vset.pattern.permute.xlu0 %v936_v2  ;;  %856 = vset.pattern.permute.xlu1 %v936_v2  ;;  %v278_v4 = vld [vmem:[%s1170_s1 + $0x10] sm:$0xff]  ;;  %v276_v5 = vld [vmem:[%s1170_s1] sm:$0xff]  ;;  %v281_v6 = vld [vmem:[%s1170_s1 + $0x28] sm:$0xff]  ;;  %s271_s23 = scalar_select %p270_p10, %s1002_s28, 1  ;;  %vm939_vm1 = vmmov 0  }
  0x15   : > { %361 = vperm.xlu1 %856, %v282_v0   ;;  %353 = vperm.xlu0 %858, %v280_v1   ;;  %v394_v8 = vld [vmem:[%s1171_s2 + $0x30] sm:$0xff]  ;;  %v395_v9 = vld [vmem:[%s1171_s2 + $0x38] sm:$0xff]  ;;  %v393_v11 = vld [vmem:[%s1171_s2 + $0x28] sm:$0xff]  ;;  %v325_v33 = vshrl.u32 %v324_v30, 7 }
  0x16   : > { %v279_v10 = vld [vmem:[%s1170_s1 + $0x18] sm:$0xff]  ;;  %v392_v13 = vld [vmem:[%s1171_s2 + $0x20] sm:$0xff]  ;;  %v470_v14 = vld [vmem:[%s1173_s4 + $0x30] sm:$0xff]  ;;  %s757_s29 = sshll.u32 %s271_s23, 1  ;;  %s756_s23 = sshll.u32 %s267_s22, 2 }
  0x17   : > { %v391_v12 = vld [vmem:[%s1171_s2 + $0x18] sm:$0xff]  ;;  %v468_v15 = vld [vmem:[%s1173_s4 + $0x20] sm:$0xff]  ;;  %v466_v16 = vld [vmem:[%s1173_s4 + $0x10] sm:$0xff]  ;;  %s273_s13 = scalar_lea.vmem %s1169_s0, %s757_s29  ;;  %v370_v36 = vsub.s32 1, %v325_v33  ;;  %v326_v37 = vsub.s32 0, %v325_v33  ;;  %s769_s29 = sshll.u32 %s1002_s28, 6 }
  0x18   : > { %v277_v17 = vld [vmem:[%s1170_s1 + $0x8] sm:$0xff]  ;;  %v464_v18 = vld [vmem:[%s1173_s4] sm:$0xff]  ;;  %v390_v20 = vld [vmem:[%s1171_s2 + $0x10] sm:$0xff]  ;;  %s269_s8 = scalar_lea.vmem [#allocation2], %s756_s23  ;;  %s1134_s15 = scalar_lea.hbm %s1176_s7, %s769_s29 }
  0x19   : > { %365 = vperm.xlu1 %856, %v283_v3   ;;  %345 = vperm.xlu0 %858, %v278_v4   ;;  %v623_v19 = vld [vmem:[%s1175_s6] sm:$0xf]  ;;  %v389_v22 = vld [vmem:[%s1171_s2 + $0x8] sm:$0xff]  ;;  %v471_v23 = vld [vmem:[%s1173_s4 + $0x38] sm:$0xff]  ;;  %s693_s9 = sshll.u32 %s269_s8, 4  ;;  %s880_s28 = scalar_lea.vmem %s879_s19, 128  ;;  %s694_s9 = int_to_ptr.vmem [resolvable:$true] %s693_s9 }
  0x1a   : > { %v388_v21 = vld [vmem:[%s1171_s2] sm:$0xff]  ;;  %v469_v25 = vld [vmem:[%s1173_s4 + $0x28] sm:$0xff]  ;;  %v467_v26 = vld [vmem:[%s1173_s4 + $0x18] sm:$0xff]  ;;  %s874_s17 = scalar_lea.vmem %s694_s9, 64  ;;  %p881_p0 = scmp.lt.s32.totalorder %s694_s9, %s879_s19 }
  0x1b   : > { %v866_v24 = vld [vmem:[%s1172_s3] sm:$0xff]   ;;  %v465_v27 = vld [vmem:[%s1173_s4 + $0x8] sm:$0xff]  ;;  %p875_p11 = scmp.ne.s32.totalorder %s694_s9, %s874_s17  ;;  %p882_p1 = scmp.lt.s32.totalorder %s880_s28, %s874_s17 }
  0x1c   : > { %793 = vmatprep.mubr.msk.bf16.mxu0 %vm532_vm0, %v866_v24  ;;  %v275_v38 = vld [vmem:[%s273_s13] sm:$0x3] }
  0x1d   : > { %857 = vset.pattern.permute.xlu1 %v937_v7  ;;  %337 = vperm.xlu0 %858, %v276_v5   ;;  %v371_v41 = vrot.slane %v275_v38, %v370_v36  ;;  %v327_v42 = vrot.slane %v275_v38, %v326_v37  ;;  %p876_p12 = pnand %p875_p11, %p1019_p5  ;;  %p883_p2 = por %p882_p1, %p881_p0 }
  0x1e   : > { %311 = vperm.xlu1 %857, %v281_v6  }
  0x1f   : > { %p877_p13 = pneg %p876_p12 }
  0x21   : > { %863 = vset.pattern.permute.xlu0 %v937_v7  ;;  %p884_p3 = pnand %p883_p2, %p877_p13 }
  0x22   : > { %859 = vset.pattern.permute.xlu1 %v936_v2  ;;  %316 = vperm.xlu0 %863, %v282_v0  }
  0x23   : > { %357 = vperm.xlu1 %859, %v281_v6  }
  0x26   : > { %321 = vperm.xlu0 %863, %v283_v3  }
  0x27   : > { %860 = vset.pattern.permute.xlu1 %v937_v7 }
  0x28   : > { %428 = vperm.xlu1 %860, %v394_v8  }
  0x2a   : > { %306 = vperm.xlu0 %863, %v280_v1  }
  0x2c   : > { %296 = vperm.xlu1 %860, %v278_v4  }
  0x2e   : > { %433 = vperm.xlu0 %863, %v395_v9  }
  0x30   : > { %301 = vperm.xlu1 %860, %v279_v10  }
  0x32   : > { %423 = vperm.xlu0 %863, %v393_v11  }
  0x34   : > { %861 = vset.pattern.permute.xlu1 %v936_v2 }
  0x35   : > { %349 = vperm.xlu1 %861, %v279_v10  }
  0x36   : > { %413 = vperm.xlu0 %863, %v391_v12  }
  0x39   : > { %862 = vset.pattern.permute.xlu1 %v937_v7 }
  0x3a   : > { %418 = vperm.xlu1 %862, %v392_v13   ;;  %504 = vperm.xlu0 %863, %v470_v14  }
  0x3e   : > { %494 = vperm.xlu0 %863, %v468_v15   ;;  %286 = vperm.xlu1 %862, %v276_v5  }
  0x42   : > { %484 = vperm.xlu0 %863, %v466_v16   ;;  %291 = vperm.xlu1 %862, %v277_v17  }
  0x46   : > { %474 = vperm.xlu0 %863, %v464_v18   ;;  %864 = vset.pattern.permute.xlu1 %v936_v2 }
  0x47   : > { %341 = vperm.xlu1 %864, %v277_v17  }
  0x4a   : > { %626 = vperm.xlu0 %863, %v623_v19  }
  0x4b   : > { %865 = vset.pattern.permute.xlu1 %v937_v7 }
  0x4c   : > { %408 = vperm.xlu1 %865, %v390_v20  }
  0x50   : > { %398 = vperm.xlu1 %865, %v388_v21  }
  0x54   : > { %403 = vperm.xlu1 %865, %v389_v22  }
  0x58   : > { %509 = vperm.xlu1 %865, %v471_v23  }
  0x5c   : > { %499 = vperm.xlu1 %865, %v469_v25  }
  0x60   : > { %489 = vperm.xlu1 %865, %v467_v26  }
  0x64   : > { %479 = vperm.xlu1 %865, %v465_v27  }
  0x90   : > { %v362_v28 = vpop.permute.xlu1 %361  ;;  %v354_v29 = vpop.permute.xlu0 %353 }
  0x91   : > { %v378_v46 = vmul.f32 %v371_v41, %v362_v28  ;;  %v376_v61 = vmul.f32 %v371_v41, %v354_v29 }
  0x94   : > { %v366_v31 = vpop.permute.xlu1 %365  ;;  %v346_v32 = vpop.permute.xlu0 %345 }
  0x95   : > { %v379_v49 = vmul.f32 %v371_v41, %v366_v31  ;;  %v374_v14 = vmul.f32 %v371_v41, %v346_v32 }
  0x98   : > { %v338_v34 = vpop.permute.xlu0 %337 }
  0x99   : > { %v312_v35 = vpop.permute.xlu1 %311  ;;  %v372_v24 = vmul.f32 %v371_v41, %v338_v34  ;;  %v867_v34 = vld [vmem:[%s1172_s3 + $0x8] sm:$0xff]  }
  0x9a   : > { %v333_v62 = vmul.f32 %v327_v42, %v312_v35 }
  0x9d   : > { %v317_v39 = vpop.permute.xlu0 %316 }
  0x9e   : > { %v358_v40 = vpop.permute.xlu1 %357  ;;  %v334_v44 = vmul.f32 %v327_v42, %v317_v39 }
  0x9f   : > { %v377_v59 = vmul.f32 %v371_v41, %v358_v40  ;;  %v868_v40 = vld [vmem:[%s1172_s3 + $0x10] sm:$0xff]  }
  0xa0   : > { %v386_v50 = vadd.f32 %v378_v46, %v334_v44 }
  0xa1   : > { %v322_v43 = vpop.permute.xlu0 %321  ;;  %v385_v2 = vadd.f32 %v377_v59, %v333_v62 }
  0xa2   : > { %v335_v47 = vmul.f32 %v327_v42, %v322_v43 }
  0xa3   : > { %v429_v45 = vpop.permute.xlu1 %428 }
  0xa4   : > { %v442_v52 = vadd.f32 %v429_v45, %v386_v50  ;;  %v387_v53 = vadd.f32 %v379_v49, %v335_v47 }
  0xa5   : > { %v307_v48 = vpop.permute.xlu0 %306 }
  0xa6   : > { %v450_v57 = vmax.f32 %v442_v52, 0.0  ;;  %v332_v63 = vmul.f32 %v327_v42, %v307_v48 }
  0xa7   : > { %v297_v51 = vpop.permute.xlu1 %296 }
  0xa8   : > { %v384_v4 = vadd.f32 %v376_v61, %v332_v63  ;;  %v330_v15 = vmul.f32 %v327_v42, %v297_v51 }
  0xa9   : > { %v434_v54 = vpop.permute.xlu0 %433 }
  0xaa   : > { %v443_v55 = vadd.f32 %v434_v54, %v387_v53  ;;  %v382_v20 = vadd.f32 %v374_v14, %v330_v15  ;;  %v618_v15 = vld [vmem:[%s1174_s5] sm:$0x3] }
  0xab   : > { %v302_v56 = vpop.permute.xlu1 %301 }
  0xac   : > { %v451_v58 = vmax.f32 %v443_v55, 0.0  ;;  %v331_v13 = vmul.f32 %v327_v42, %v302_v56 }
  0xad   : > { %v424_v1 = vpop.permute.xlu0 %423 }
  0xae   : > { %v463_v60 = vpack.c.bf16 %v451_v58, %v450_v57  ;;  %v441_v3 = vadd.f32 %v424_v1, %v385_v2 }
  0xb0   : > { %v350_v0 = vpop.permute.xlu1 %349  ;;  %785 = vmatprep.subr.bf16.mxu0 %v463_v60  ;;  %v449_v7 = vmax.f32 %v441_v3, 0.0 }
  0xb1   : > { %786 = vmatpush3.bf16.msra.mxu0 %v463_v60  ;;  %v375_v12 = vmul.f32 %v371_v41, %v350_v0  ;;  %v414_v18 = vpop.permute.xlu0 %413 }
  0xb3   : > { %v383_v16 = vadd.f32 %v375_v12, %v331_v13 }
  0xb5   : > { %v419_v5 = vpop.permute.xlu1 %418  ;;  %v439_v19 = vadd.f32 %v414_v18, %v383_v16  ;;  %v505_v46 = vpop.permute.xlu0 %504 }
  0xb6   : > { %v440_v6 = vadd.f32 %v419_v5, %v384_v4 }
  0xb7   : > { %v447_v25 = vmax.f32 %v439_v19, 0.0 }
  0xb8   : > { %v448_v8 = vmax.f32 %v440_v6, 0.0 }
  0xb9   : > { %v287_v9 = vpop.permute.xlu1 %286  ;;  %v495_v51 = vpop.permute.xlu0 %494 }
  0xba   : > { %v462_v10 = vpack.c.bf16 %v449_v7, %v448_v8  ;;  %v328_v22 = vmul.f32 %v327_v42, %v287_v9 }
  0xbc   : > { %787 = vmatprep.subr.bf16.mxu0 %v462_v10  ;;  %v380_v31 = vadd.f32 %v372_v24, %v328_v22 }
  0xbd   : > { %v292_v11 = vpop.permute.xlu1 %291  ;;  %788 = vmatpush3.bf16.msra.mxu0 %v462_v10  ;;  %v485_v62 = vpop.permute.xlu0 %484 }
  0xbe   : > { %v329_v29 = vmul.f32 %v327_v42, %v292_v11  ;;  %v938_v42 = vmov 0.0  }
  0xbf   : > { %801 = vmatprep.subr.bf16.mxu1 %v938_v42  ;;  %809 = vmatprep.mubr.msk.bf16.mxu1 %vm939_vm1, %v938_v42 }
  0xc1   : > { %v475_v8 = vpop.permute.xlu0 %474 }
  0xc2   : > { %v342_v17 = vpop.permute.xlu1 %341 }
  0xc3   : > { %v373_v26 = vmul.f32 %v371_v41, %v342_v17  ;;  %v869_v41 = vld [vmem:[%s1172_s3 + $0x18] sm:$0xff]  }
  0xc5   : > { %v381_v32 = vadd.f32 %v373_v26, %v329_v29  ;;  %v627_v16 = vpop.permute.xlu0 %626 }
  0xc7   : > { %v409_v21 = vpop.permute.xlu1 %408 }
  0xc8   : > { %v438_v23 = vadd.f32 %v409_v21, %v382_v20 }
  0xca   : > { %v446_v27 = vmax.f32 %v438_v23, 0.0 }
  0xcb   : > { %v399_v28 = vpop.permute.xlu1 %398 }
  0xcc   : > { %v461_v30 = vpack.c.bf16 %v447_v25, %v446_v27  ;;  %v436_v33 = vadd.f32 %v399_v28, %v380_v31 }
  0xce   : > { %789 = vmatprep.subr.bf16.mxu0 %v461_v30  ;;  %v444_v37 = vmax.f32 %v436_v33, 0.0 }
  0xcf   : > { %v404_v35 = vpop.permute.xlu1 %403  ;;  %790 = vmatpush3.bf16.msra.mxu0 %v461_v30 }
  0xd0   : > { %v437_v36 = vadd.f32 %v404_v35, %v381_v32 }
  0xd2   : > { %v445_v38 = vmax.f32 %v437_v36, 0.0 }
  0xd3   : > { %v510_v44 = vpop.permute.xlu1 %509 }
  0xd4   : > { %v460_v39 = vpack.c.bf16 %v445_v38, %v444_v37 }
  0xd6   : > { %791 = vmatprep.subr.bf16.mxu0 %v460_v39 }
  0xd7   : > { %792 = vmatpush3.bf16.msra.mxu0 %v460_v39  ;;  %v500_v49 = vpop.permute.xlu1 %499 }
  0xda   : > { %794 = vmatmul.mubr.msk.bf16.vlgmr.msra.gmra.mxu0 %vm532_vm0, %v867_v34 }
  0xdb   : > { %797 = vmatprep.mubr.msk.bf16.mxu0 %vm532_vm0, %v868_v40  ;;  %v490_v56 = vpop.permute.xlu1 %489 }
  0xdf   : > { %v480_v4 = vpop.permute.xlu1 %479 }
  0xe2   : > { %798 = vmatmul.mubr.msk.bf16.gmra.mxu0 %vm532_vm0, %v869_v41 }
 0x19a   : > { %v795_v43 = vpop.f32.mrf.mxu0 }
 0x19b   : > { %v588_v2 = vadd.f32 %v795_v43, %v485_v62 }
 0x19c   : > { %v579_v45 = vpop.f32.mrf.mxu0 }
 0x19d   : > { %v612_v9 = vmax.f32 %v588_v2, 0.0  ;;  %v580_v10 = vadd.f32 %v579_v45, %v475_v8 }
 0x19e   : > { %v796_v47 = vpop.f32.mrf.mxu0 }
 0x19f   : > { %v591_v63 = vadd.f32 %v796_v47, %v490_v56  ;;  %v610_v13 = vmax.f32 %v580_v10, 0.0 }
 0x1a0   : > { %v582_v48 = vpop.f32.mrf.mxu0 }
 0x1a1   : > { %v613_v5 = vmax.f32 %v591_v63, 0.0  ;;  %v583_v6 = vadd.f32 %v582_v48, %v480_v4 }
 0x1a2   : > { %v799_v50 = vpop.f32.mrf.mxu0 }
 0x1a3   : > { %v604_v53 = vadd.f32 %v799_v50, %v505_v46  ;;  %v620_v11 = vpack.c.bf16 %v613_v5, %v612_v9  ;;  %v611_v12 = vmax.f32 %v583_v6, 0.0 }
 0x1a4   : > { %v595_v52 = vpop.f32.mrf.mxu0 }
 0x1a5   : > { %v616_v58 = vmax.f32 %v604_v53, 0.0  ;;  %v596_v59 = vadd.f32 %v595_v52, %v495_v51  ;;  %v619_v14 = vpack.c.bf16 %v611_v12, %v610_v13 }
 0x1a6   : > { %v800_v54 = vpop.f32.mrf.mxu0 }
 0x1a7   : > { %v607_v55 = vadd.f32 %v800_v54, %v510_v44  ;;  %v614_v3 = vmax.f32 %v596_v59, 0.0 }
 0x1a8   : > { %v598_v57 = vpop.f32.mrf.mxu0 }
 0x1a9   : > { %v617_v60 = vmax.f32 %v607_v55, 0.0  ;;  %v599_v61 = vadd.f32 %v598_v57, %v500_v49 }
 0x1ab   : > { %v615_v0 = vmax.f32 %v599_v61, 0.0  ;;  %v622_v1 = vpack.c.bf16 %v617_v60, %v616_v58 }
 0x1ad   : > { %802 = vmatpush3.bf16.msra.mxu1 %v622_v1  ;;  %v621_v7 = vpack.c.bf16 %v615_v0, %v614_v3 }
 0x1ae   : > { %803 = vmatprep.subr.bf16.mxu1 %v938_v42 }
 0x1b1   : > { %804 = vmatpush3.bf16.msra.mxu1 %v621_v7 }
 0x1b2   : > { %805 = vmatprep.subr.bf16.mxu1 %v938_v42 }
 0x1b5   : > { %806 = vmatpush3.bf16.msra.mxu1 %v620_v11 }
 0x1b6   : > { %807 = vmatprep.subr.bf16.mxu1 %v938_v42 }
 0x1b9   : > { %808 = vmatpush3.bf16.msra.mxu1 %v619_v14 }
 0x1bc   : > { %810 = vmatmul.mubr.msk.bf16.vlgmr.msra.gmra.mxu1 %vm532_vm0, %v618_v15 }
 0x27c   : > { %v666_v17 = vpop.f32.mrf.mxu1 }
 0x27d   : > { %v667_v18 = vadd.f32 %v666_v17, %v627_v16 }
 0x27e   : > { %v811_v19 = vpop.f32.mrf.mxu1 }
 0x27f   : > { %v767_v20 = vmul.f32 -1.442695, %v667_v18 }
 0x280   : > { %v669_v21 = vpop.f32.mrf.mxu1 }
 0x281   : > { %870 = vpow2.f32 %v767_v20 }
 0x282   : > { %v812_v22 = vpop.f32.mrf.mxu1 }
 0x28e   : > { %v871_v23 = vpop.eup %870 }
 0x28f   : > { %v675_v24 = vadd.f32 1.0, %v871_v23 }
 0x291   : > { %872 = vrcp.f32 %v675_v24 }
 0x29e   : > { %v873_v25 = vpop.eup %872 }
 0x29f   : > { %678 = vst [vmem:[%s269_s8] sm:$0xf] %v873_v25 }
 0x2a0   : > { %887 = shalt.err (!%p884_p3)
}
 0x2a1   : > { %s888_s20 = scalar_lea.hbm %s1134_s15, 64  ;;  %s892_s23 = scalar_lea.hbm %s1176_s7, 128 }
 0x2a2   : > { %p889_p4 = scmp.ne.s32.totalorder %s1134_s15, %s888_s20  ;;  %p893_p9 = scmp.lt.s32.totalorder %s1134_s15, %s1176_s7 }
 0x2a3   : > { %p894_p10 = scmp.lt.s32.totalorder %s892_s23, %s888_s20 }
 0x2a4   : > { %p890_p7 = pnand %p889_p4, %p1019_p5 }
 0x2a5   : > { %p895_p11 = por %p894_p10, %p893_p9 }
 0x2a6   : > { %p891_p8 = pneg %p890_p7 }
 0x2a8   : > { %p896_p12 = pnand %p895_p11, %p891_p8 }
 0x2aa   : > { %899 = shalt.err (!%p896_p12)
}
 0x2ab   : > { %813 = dma.vmem_to_hbm [thread:$0]  (%p1019_p5), %s694_s9, 64, %s1134_s15, %s680_s16  }
 0x2ac PF: > { %p819_p13 = scmp.ge.s32.totalorder %s934_s27, 2  ;;  %s705_s13 = sand.u32 1, %s922_s24  }
 0x2ad   : > { %s706_s14 = scalar_lea.sflag [#allocation3], %s705_s13 }
 0x2ae   : > { %p816_p0 = pnand %p819_p13, %p1023_p6 }
 0x2b0   : > { %p817_p1 = pneg %p816_p0 }
 0x2b2   : > { %917 = dma.done.wait (%p817_p1), %s706_s14, 64  }
 0x2b3   : > { %919 = vsyncadd (%p817_p1), %s706_s14, 4294967232  ;;  %p17_p2 = scmp.ge.s32.totalorder %s1006_s30, 4   ;;  %s1179_s24 = smov %s926_s25 }
 0x2b4   : > { %s1180_s25 = smov %s930_s26  ;;  %s1181_s26 = smov %s1017_s10 }
 0x2b5   : > { %s1182_s27 = smov %s1006_s30  ;;  %19 = sbr.rel (!%p17_p2) target bundleno = 3 (0x3), region = 83 }
 0x2ba   :  { %711 = vsyncpa [#allocation3], 1 }
 0x2bb   :  { %713 = vsyncpa [#allocation3 + $0x1], 1 }

</bundles_post_ra>
